<compile_context>
chip_gen: v6e
topology: v6e:2x2x1
jax: 0.10.0
libtpu: 0.0.40
codegen_flags: <defaults>
</compile_context>

<pallas_src>
import jax
import jax.numpy as jnp
from jax.experimental import pallas as pl
from jax.experimental.pallas import tpu as pltpu


# -----------------------------------------------------------------------------
# Kernels
# -----------------------------------------------------------------------------
def _make_gcn1_kernel(tk):
    """Row-tile of:  relu(A @ XW1 + b1) @ W_comb   -> f32 out, f32 accumulate.

    XW1 is VMEM-resident (full slab); the K-slab is sliced in-kernel."""

    def kernel(a_ref, xw1_ref, b1_ref, wc_ref, out_ref, acc_ref):
        k = pl.program_id(1)

        @pl.when(k == 0)
        def _():
            acc_ref[...] = jnp.zeros_like(acc_ref)

        start = pl.multiple_of(k * tk, tk)
        xw1_slab = xw1_ref[pl.ds(start, tk), :]                      # bf16 (tk, h_pad)
        acc_ref[...] += jnp.dot(a_ref[...], xw1_slab,
                                preferred_element_type=jnp.float32)

        @pl.when(k == pl.num_programs(1) - 1)
        def _():
            h1 = jnp.maximum(acc_ref[...] + b1_ref[...], 0.0)        # bias + ReLU once
            out_ref[...] = jnp.dot(h1.astype(wc_ref.dtype), wc_ref[...],
                                   preferred_element_type=jnp.float32)

    return kernel


def _make_gcn2_kernel(tk):
    """Row-tile of:  A @ H1W + b_comb  — accumulate directly into the resident
    f32 output block (no scratch)."""

    def kernel(a_ref, h1w_ref, bc_ref, out_ref):
        k = pl.program_id(1)

        @pl.when(k == 0)
        def _():
            out_ref[...] = jnp.zeros_like(out_ref)

        start = pl.multiple_of(k * tk, tk)
        h1w_slab = h1w_ref[pl.ds(start, tk), :]                      # f32 (tk, f_pad)
        out_ref[...] += jnp.dot(a_ref[...].astype(jnp.float32), h1w_slab,
                                preferred_element_type=jnp.float32)

        @pl.when(k == pl.num_programs(1) - 1)
        def _():
            out_ref[...] += bc_ref[...]

    return kernel


# -----------------------------------------------------------------------------
# Host-side wrapper
# -----------------------------------------------------------------------------
def _round_up(x, m):
    return ((x + m - 1) // m) * m


def _tiles_for(n):
    """Pick (n_pad, tile) with tm == tk so n_pad = round_up(n, tile)."""
    n128 = _round_up(max(n, 8), 128)
    if n128 <= 512:
        return n128, n128                     # single tile, no extra padding
    tile = 1024 if n128 >= 2048 else 512      # big tiles: grid overhead << A DMA
    return _round_up(n128, tile), tile


def gnn_autoencoder(x, edge_index, params):
    """x: [N, F] float32, edge_index: [2, E] int32 (src, dst) -> x_hat [N, F]."""
    n, f_in = x.shape
    w1, b1, w2, b2, wd, bd = params
    hid = w1.shape[1]

    n_pad, tile = _tiles_for(n)
    h_pad = _round_up(hid, 128)               # keep exactly 128-wide — never pad to 256
    f_pad = _round_up(f_in, 128)

    # --- glue: dense normalized adjacency built directly at padded shape -----
    src, dst = edge_index[0], edge_index[1]
    deg = jnp.ones((n,), jnp.float32).at[dst].add(1.0)            # in-degree + self-loop
    dinv = jax.lax.rsqrt(deg)
    a = jnp.zeros((n_pad, n_pad), jnp.float32)
    a = a.at[dst, src].add(dinv[dst] * dinv[src])                 # messages j -> i
    idx = jnp.arange(n)
    a = a.at[idx, idx].add(dinv * dinv)                           # self-loops
    a_p = a.astype(jnp.bfloat16)                                  # single cast, no re-pad
    # NOTE: correctness of the padded region relies on A's pad rows/columns
    # being exactly zero (they neutralize the relu(b1)@W_comb junk written into
    # H1W's pad rows).  Keep them zero if A construction changes.
    # TODO(synk): for genuinely sparse graphs at scale, replace this O(N^2)
    # densification with a scalar-prefetch gather kernel over neighbor lists.

    # --- fold decoder into layer 2 (exact: no nonlinearity in between) -------
    w_comb = w2 @ wd                                              # [hid, f_in]
    b_comb = b2 @ wd + bd                                         # [f_in]

    # --- hoist the tiny K=f_in feature transform out of the hot loop ---------
    xw1 = x @ w1                                                  # [n, hid]

    xw1_p = jnp.zeros((n_pad, h_pad), jnp.bfloat16).at[:n, :hid].set(
        xw1.astype(jnp.bfloat16))
    b1_p = jnp.zeros((1, h_pad), jnp.float32).at[0, :hid].set(b1)
    wc_p = jnp.zeros((h_pad, f_pad), jnp.bfloat16).at[:hid, :f_in].set(
        w_comb.astype(jnp.bfloat16))
    bc_p = jnp.zeros((1, f_pad), jnp.float32).at[0, :f_in].set(b_comb)

    grid = (n_pad // tile, n_pad // tile)
    cparams = pltpu.CompilerParams(
        dimension_semantics=("parallel", "arbitrary"),   # rows shard across TCs on v7x
        vmem_limit_bytes=32 * 1024 * 1024,
    )
    # TODO(synk): for moderate N (2*N^2 bytes << VMEM) fuse both passes into one
    # pallas_call keeping A on-chip to halve total HBM traffic.

    # --- pass 1: H1W = relu(A @ XW1 + b1) @ W_comb  (f32 inter-pass) ----------
    h1w = pl.pallas_call(
        _make_gcn1_kernel(tile),
        out_shape=jax.ShapeDtypeStruct((n_pad, f_pad), jnp.float32),
        grid_spec=pltpu.PrefetchScalarGridSpec(
            num_scalar_prefetch=0,
            grid=grid,
            in_specs=[
                pl.BlockSpec((tile, tile), lambda i, k: (i, k)),     # A tile (streamed)
                pl.BlockSpec((n_pad, h_pad), lambda i, k: (0, 0)),   # XW1 (resident)
                pl.BlockSpec((1, h_pad), lambda i, k: (0, 0)),       # b1 (resident)
                pl.BlockSpec((h_pad, f_pad), lambda i, k: (0, 0)),   # W_comb (resident)
            ],
            out_specs=pl.BlockSpec((tile, f_pad), lambda i, k: (i, 0)),
            scratch_shapes=[pltpu.VMEM((tile, h_pad), jnp.float32)],
        ),
        compiler_params=cparams,
    )(a_p, xw1_p, b1_p, wc_p)

    # --- pass 2: x_hat = A @ H1W + b_comb  (accumulate into resident out) -----
    out_p = pl.pallas_call(
        _make_gcn2_kernel(tile),
        out_shape=jax.ShapeDtypeStruct((n_pad, f_pad), jnp.float32),
        grid_spec=pltpu.PrefetchScalarGridSpec(
            num_scalar_prefetch=0,
            grid=grid,
            in_specs=[
                pl.BlockSpec((tile, tile), lambda i, k: (i, k)),     # A tile (streamed)
                pl.BlockSpec((n_pad, f_pad), lambda i, k: (0, 0)),   # H1W (resident)
                pl.BlockSpec((1, f_pad), lambda i, k: (0, 0)),       # b_comb (resident)
            ],
            out_specs=pl.BlockSpec((tile, f_pad), lambda i, k: (i, 0)),
        ),
        compiler_params=cparams,
    )(a_p, h1w, bc_p)

    return out_p[:n, :f_in]


def init_params(key, in_channels, hidden_channels, out_channels):
    k1, k2, k3, k4, k5, k6 = jax.random.split(key, 6)
    w1 = jax.random.normal(k1, (in_channels, hidden_channels), jnp.float32) * 0.1
    b1 = jax.random.normal(k2, (hidden_channels,), jnp.float32) * 0.01
    w2 = jax.random.normal(k3, (hidden_channels, out_channels), jnp.float32) * 0.1
    b2 = jax.random.normal(k4, (out_channels,), jnp.float32) * 0.01
    # torch.nn.Linear(out_channels, in_channels): stored transposed as [out, in]
    wd = jax.random.normal(k5, (out_channels, in_channels), jnp.float32) * 0.1
    bd = jax.random.normal(k6, (in_channels,), jnp.float32) * 0.01
    return (w1, b1, w2, b2, wd, bd)


def _reference(x, edge_index, params):
    """Pure-JAX f32 reference of the original module (unfused)."""
    n = x.shape[0]
    w1, b1, w2, b2, wd, bd = params
    src, dst = edge_index[0], edge_index[1]
    deg = jnp.ones((n,), jnp.float32).at[dst].add(1.0)
    dinv = jax.lax.rsqrt(deg)
    a = jnp.zeros((n, n), jnp.float32)
    a = a.at[dst, src].add(dinv[dst] * dinv[src])
    a = a + jnp.diag(dinv * dinv)
    h1 = jnp.maximum(a @ (x @ w1) + b1, 0.0)
    z = a @ (h1 @ w2) + b2
    return z @ wd + bd


if __name__ == "__main__":
    # small shapes consistent with the module: hidden=64, out_channels=32
    N, F_IN, HID, F_OUT = 16, 8, 64, 32
    E = 32

    key = jax.random.PRNGKey(0)
    kx, ke, kp = jax.random.split(key, 3)

    x = jax.random.normal(kx, (N, F_IN), jnp.float32)
    edge_index = jax.random.randint(ke, (2, E), 0, N, dtype=jnp.int32)
    params = init_params(kp, F_IN, HID, F_OUT)

    x_hat = gnn_autoencoder(x, edge_index, params)
    jax.block_until_ready(x_hat)
    assert x_hat.shape == (N, F_IN)

    ref = _reference(x, edge_index, params)
    # bf16 A / XW1 / h1 with f32 accumulation and f32 inter-pass -> loose tolerance
    assert jnp.allclose(x_hat, ref, rtol=0.1, atol=0.05), (
        float(jnp.max(jnp.abs(x_hat - ref))))

    print("KERNEL_OK")
</pallas_src>

<mosaic_0001>
module attributes {stable_mosaic.version = 11 : i64} {
  func.func @kernel(%arg0: i32, %arg1: i32, %arg2: memref<128x128xbf16, #tpu.memory_space<vmem>>, %arg3: memref<128x128xbf16, #tpu.memory_space<vmem>>, %arg4: memref<1x128xf32, #tpu.memory_space<vmem>>, %arg5: memref<128x128xbf16, #tpu.memory_space<vmem>>, %arg6: memref<128x128xf32, #tpu.memory_space<vmem>>, %arg7: memref<128x128xf32, #tpu.memory_space<vmem>>) attributes {dimension_semantics = [#tpu.dimension_semantics<parallel>, #tpu.dimension_semantics<arbitrary>], iteration_bounds = array<i64: 1, 1>, scalar_prefetch = 0 : i64, scratch_operands = 1 : i64, tpu.core_type = #tpu.core_type<tc>, window_params = [{transform_indices = @transform_0, window_bounds = array<i64: 128, 128>}, {pipeline_mode = #tpu.pipeline_mode<synchronous>, transform_indices = @transform_1, window_bounds = array<i64: 128, 128>}, {pipeline_mode = #tpu.pipeline_mode<synchronous>, transform_indices = @transform_2, window_bounds = array<i64: 1, 128>}, {pipeline_mode = #tpu.pipeline_mode<synchronous>, transform_indices = @transform_3, window_bounds = array<i64: 128, 128>}, {transform_indices = @transform_4, window_bounds = array<i64: 128, 128>}]} {
    %c0_i32 = arith.constant 0 : i32
    %0 = arith.cmpi eq, %arg1, %c0_i32 : i32
    %1 = arith.extui %0 : i1 to i32
    %c0_i32_0 = arith.constant 0 : i32
    %2 = arith.cmpi ne, %1, %c0_i32_0 : i32
    scf.if %2 {
      %cst_9 = arith.constant 0.000000e+00 : f32
      %15 = vector.broadcast %cst_9 : f32 to vector<128x128xf32>
      %c0_10 = arith.constant 0 : index
      %c0_11 = arith.constant 0 : index
      %16 = vector.load %arg7[%c0_10, %c0_11] : memref<128x128xf32, #tpu.memory_space<vmem>>, vector<128x128xf32>
      tpu.vector_store %arg7[%c0_10, %c0_11], %15 {strides = array<i32>} : memref<128x128xf32, #tpu.memory_space<vmem>>, vector<128x128xf32>,
    } else {
    }
    %c128_i32 = arith.constant 128 : i32
    %3 = arith.muli %arg1, %c128_i32 : i32
    %4 = tpu.assume_multiple %3, 128 : i32
    %5 = arith.index_cast %4 : i32 to index
    %c0 = arith.constant 0 : index
    %6 = vector.load %arg3[%5, %c0] : memref<128x128xbf16, #tpu.memory_space<vmem>>, vector<128x128xbf16>
    %c0_1 = arith.constant 0 : index
    %c0_2 = arith.constant 0 : index
    %7 = vector.load %arg7[%c0_1, %c0_2] : memref<128x128xf32, #tpu.memory_space<vmem>>, vector<128x128xf32>
    %c0_3 = arith.constant 0 : index
    %c0_4 = arith.constant 0 : index
    %8 = vector.load %arg2[%c0_3, %c0_4] : memref<128x128xbf16, #tpu.memory_space<vmem>>, vector<128x128xbf16>
    %cst = arith.constant dense<0.000000e+00> : vector<128x128xf32>
    %9 = tpu.matmul %8, %6, %cst {dimension_numbers = #tpu.dot_dimension_numbers<[1], [0], [0], [1], [0, 0, 1, 1], [], []>} : vector<128x128xbf16>, vector<128x128xbf16>, vector<128x128xf32> -> vector<128x128xf32>
    %10 = arith.addf %7, %9 : vector<128x128xf32>
    %c0_5 = arith.constant 0 : index
    %c0_6 = arith.constant 0 : index
    %11 = vector.load %arg7[%c0_5, %c0_6] : memref<128x128xf32, #tpu.memory_space<vmem>>, vector<128x128xf32>
    tpu.vector_store %arg7[%c0_5, %c0_6], %10 {strides = array<i32>} : memref<128x128xf32, #tpu.memory_space<vmem>>, vector<128x128xf32>,
    %c0_i32_7 = arith.constant 0 : i32
    %12 = arith.cmpi eq, %arg1, %c0_i32_7 : i32
    %13 = arith.extui %12 : i1 to i32
    %c0_i32_8 = arith.constant 0 : i32
    %14 = arith.cmpi ne, %13, %c0_i32_8 : i32
    scf.if %14 {
      %c0_9 = arith.constant 0 : index
      %c0_10 = arith.constant 0 : index
      %15 = vector.load %arg7[%c0_9, %c0_10] : memref<128x128xf32, #tpu.memory_space<vmem>>, vector<128x128xf32>
      %c0_11 = arith.constant 0 : index
      %c0_12 = arith.constant 0 : index
      %16 = vector.load %arg4[%c0_11, %c0_12] : memref<1x128xf32, #tpu.memory_space<vmem>>, vector<1x128xf32>
      %17 = vector.broadcast %16 : vector<1x128xf32> to vector<128x128xf32>
      %18 = arith.addf %15, %17 : vector<128x128xf32>
      %cst_13 = arith.constant 0.000000e+00 : f32
      %19 = vector.broadcast %cst_13 : f32 to vector<128x128xf32>
      %20 = arith.maximumf %18, %19 : vector<128x128xf32>
      %21 = arith.truncf %20 : vector<128x128xf32> to vector<128x128xbf16>
      %c0_14 = arith.constant 0 : index
      %c0_15 = arith.constant 0 : index
      %22 = vector.load %arg5[%c0_14, %c0_15] : memref<128x128xbf16, #tpu.memory_space<vmem>>, vector<128x128xbf16>
      %cst_16 = arith.constant dense<0.000000e+00> : vector<128x128xf32>
      %23 = tpu.matmul %21, %22, %cst_16 {dimension_numbers = #tpu.dot_dimension_numbers<[1], [0], [0], [1], [0, 0, 1, 1], [], []>} : vector<128x128xbf16>, vector<128x128xbf16>, vector<128x128xf32> -> vector<128x128xf32>
      %c0_17 = arith.constant 0 : index
      %c0_18 = arith.constant 0 : index
      %24 = vector.load %arg6[%c0_17, %c0_18] : memref<128x128xf32, #tpu.memory_space<vmem>>, vector<128x128xf32>
      tpu.vector_store %arg6[%c0_17, %c0_18], %23 {strides = array<i32>} : memref<128x128xf32, #tpu.memory_space<vmem>>, vector<128x128xf32>,
    } else {
    }
    return
  }
  func.func @transform_0(%arg0: i32, %arg1: i32) -> (i32, i32) {
    %c0_i32 = arith.constant 0 : i32
    return %arg0, %arg1 : i32, i32
  }
  func.func @transform_1(%arg0: i32, %arg1: i32) -> (i32, i32) {
    %c0_i32 = arith.constant 0 : i32
    %c0_i32_0 = arith.constant 0 : i32
    %c0_i32_1 = arith.constant 0 : i32
    return %c0_i32, %c0_i32_0 : i32, i32
  }
  func.func @transform_2(%arg0: i32, %arg1: i32) -> (i32, i32) {
    %c0_i32 = arith.constant 0 : i32
    %c0_i32_0 = arith.constant 0 : i32
    %c0_i32_1 = arith.constant 0 : i32
    return %c0_i32, %c0_i32_0 : i32, i32
  }
  func.func @transform_3(%arg0: i32, %arg1: i32) -> (i32, i32) {
    %c0_i32 = arith.constant 0 : i32
    %c0_i32_0 = arith.constant 0 : i32
    %c0_i32_1 = arith.constant 0 : i32
    return %c0_i32, %c0_i32_0 : i32, i32
  }
  func.func @transform_4(%arg0: i32, %arg1: i32) -> (i32, i32) {
    %c0_i32 = arith.constant 0 : i32
    %c0_i32_0 = arith.constant 0 : i32
    return %arg0, %c0_i32 : i32, i32
  }
}

</mosaic_0001>

<bundles_post_ra>
// kernel: tpu_custom_call.1
= control target key start
LH: loop header
LB: loop body
LE: loop exit
PB: predicated region body
PF: predicated region fallthrough
CT: control target
= control target key end

     0   :  { %9 = vsyncpa [#allocation4], 0  ;;  %s908_s0 = inlined_call_operand.hbm [shape: bf16[128,128], index: 0, kind: input, shape index: {}]   ;;  %s909_s1 = inlined_call_operand.hbm [shape: bf16[128,128], index: 1, kind: input, shape index: {}]   ;;  %s910_s2 = inlined_call_operand.vmem [shape: f32[1,128], index: 2, kind: input, shape index: {}]   ;;  %s911_s3 = inlined_call_operand.hbm [shape: bf16[128,128], index: 3, kind: input, shape index: {}]   ;;  %s912_s4 = inlined_call_operand.hbm [shape: f32[128,128], index: 4, kind: output, shape index: {}]  }
   0x1   :  { %10 = vsyncpa [#allocation7], 0 }
   0x2   :  { %11 = vsyncpa [#allocation5], 0  ;;  %s860_s15 = smov [#allocation6]   ;;  %s861_s17 = smov [#allocation3]  }
   0x3   :  { %s29_s16 = sshll.u32 %s860_s15, 4  ;;  %s17_s18 = sshll.u32 %s861_s17, 4  ;;  %s30_s16 = int_to_ptr.vmem [resolvable:$true] %s29_s16  ;;  %s18_s18 = int_to_ptr.vmem [resolvable:$true] %s17_s18 }
   0x4   :  { %s782_s19 = scalar_lea.vmem %s30_s16, 1024  ;;  %p787_p1 = scmp.lt.s32.totalorder %s30_s16, %s30_s16 }
   0x5   :  { %p783_p0 = scmp.ne.s32.totalorder %s30_s16, %s782_s19  ;;  %p788_p2 = scmp.lt.s32.totalorder %s782_s19, %s782_s19 }
   0x7   :  { %p789_p3 = por %p788_p2, %p787_p1 }
   0x9   :  { %p790_p4 = pnand %p789_p3, %p783_p0 }
   0xb   :  { %793 = shalt.err (!%p790_p4)
}
   0xc   :  { %s862_s20 = smov 64   ;;  %s863_s21 = smov 4  }
   0xd   :  { %35 = dma.hbm_to_vmem [thread:$0]  %s909_s1, 1024, %s30_s16, [#allocation7], %s862_s20, %s862_s20, %s863_s21  }
   0xe   :  { %s802_s24 = scalar_lea.vmem %s18_s18, 1024  ;;  %p807_p6 = scmp.lt.s32.totalorder %s18_s18, %s18_s18 }
   0xf   :  { %p803_p5 = scmp.ne.s32.totalorder %s18_s18, %s802_s24  ;;  %p808_p7 = scmp.lt.s32.totalorder %s802_s24, %s802_s24 }
  0x11   :  { %p809_p8 = por %p808_p7, %p807_p6 }
  0x13   :  { %p810_p9 = pnand %p809_p8, %p803_p5 }
  0x15   :  { %813 = shalt.err (!%p810_p9)
}
  0x16   :  { %23 = dma.hbm_to_vmem [thread:$0]  %s908_s0, 1024, %s18_s18, [#allocation4], %s862_s20, %s862_s20, %s863_s21  }
  0x17   :  { %s864_s27 = smov [#allocation8]  }
  0x18   :  { %s43_s28 = sshll.u32 %s864_s27, 4  ;;  %s44_s28 = int_to_ptr.vmem [resolvable:$true] %s43_s28 }
  0x19   :  { %s822_s29 = scalar_lea.vmem %s44_s28, 1024  ;;  %p827_p11 = scmp.lt.s32.totalorder %s44_s28, %s44_s28 }
  0x1a   :  { %p823_p10 = scmp.ne.s32.totalorder %s44_s28, %s822_s29  ;;  %p828_p12 = scmp.lt.s32.totalorder %s822_s29, %s822_s29 }
  0x1c   :  { %p829_p13 = por %p828_p12, %p827_p11 }
  0x1e   :  { %p830_p0 = pnand %p829_p13, %p823_p10 }
  0x20   :  { %833 = shalt.err (!%p830_p0)
}
  0x21   :  { %49 = dma.hbm_to_vmem [thread:$0]  %s911_s3, 1024, %s44_s28, [#allocation7], %s862_s20, %s862_s20, %s863_s21  }
  0x22   :  { %854 = dma.done.wait [#allocation4], 1024  }
  0x23   :  { %855 = vsyncadd [#allocation4], 4294966272 }
  0x24   :  { %856 = dma.done.wait [#allocation7], 2048  }
  0x25   :  { %857 = vsyncadd [#allocation7], 4294965248  ;;  %v750_v0 = vld [vmem:[#allocation6 + $0x38] sm:$0xff]   ;;  %v751_v1 = vld [vmem:[#allocation6 + $0x30] sm:$0xff]  }
  0x26   :  { %678 = vmatprep.subr.bf16.mxu0 %v750_v0  ;;  %v752_v2 = vld [vmem:[#allocation6 + $0x28] sm:$0xff]   ;;  %v753_v3 = vld [vmem:[#allocation6 + $0x20] sm:$0xff]   ;;  %v754_v5 = vld [vmem:[#allocation6 + $0x18] sm:$0xff]  }
  0x27   :  { %679 = vmatpush3.bf16.msra.mxu0 %v750_v0  ;;  %v758_v4 = vld [vmem:[#allocation3] sm:$0xff]   ;;  %v755_v6 = vld [vmem:[#allocation6 + $0x10] sm:$0xff]   ;;  %v766_v7 = vld [vmem:[#allocation8 + $0x38] sm:$0xff]  }
  0x28   :  { %680 = vmatprep.subr.bf16.mxu0 %v751_v1  ;;  %694 = vmatprep.mubr.bf16.mxu0 %v758_v4  ;;  %v767_v8 = vld [vmem:[#allocation8 + $0x30] sm:$0xff]   ;;  %v756_v9 = vld [vmem:[#allocation6 + $0x8] sm:$0xff]   ;;  %v757_v11 = vld [vmem:[#allocation6] sm:$0xff]  }
  0x29   :  { %710 = vmatprep.subr.bf16.mxu1 %v766_v7  ;;  %v768_v10 = vld [vmem:[#allocation8 + $0x28] sm:$0xff]   ;;  %v769_v12 = vld [vmem:[#allocation8 + $0x20] sm:$0xff]   ;;  %v770_v13 = vld [vmem:[#allocation8 + $0x18] sm:$0xff]  }
  0x2a   :  { %711 = vmatpush3.bf16.msra.mxu1 %v766_v7  ;;  %v759_v14 = vld [vmem:[#allocation3 + $0x8] sm:$0xff]   ;;  %v760_v15 = vld [vmem:[#allocation3 + $0x10] sm:$0xff]   ;;  %v761_v16 = vld [vmem:[#allocation3 + $0x18] sm:$0xff]  }
  0x2b   :  { %681 = vmatpush3.bf16.msra.mxu0 %v751_v1  ;;  %712 = vmatprep.subr.bf16.mxu1 %v767_v8  ;;  %v762_v17 = vld [vmem:[#allocation3 + $0x20] sm:$0xff]   ;;  %v763_v18 = vld [vmem:[#allocation3 + $0x28] sm:$0xff]   ;;  %v764_v19 = vld [vmem:[#allocation3 + $0x30] sm:$0xff]  }
  0x2c   :  { %682 = vmatprep.subr.bf16.mxu0 %v752_v2  ;;  %v765_v20 = vld [vmem:[#allocation3 + $0x38] sm:$0xff]   ;;  %v771_v21 = vld [vmem:[#allocation8 + $0x10] sm:$0xff]   ;;  %v772_v22 = vld [vmem:[#allocation8 + $0x8] sm:$0xff]  }
  0x2d   :  { %v773_v23 = vld [vmem:[#allocation8] sm:$0xff]  }
  0x2e   :  { %713 = vmatpush3.bf16.msra.mxu1 %v767_v8  ;;  %v637_v26 = vld [vmem:[%s910_s2] ss:$0 sm:$0xff]  ;;  %s865_s2 = smov [#allocation9]  }
  0x2f   :  { %683 = vmatpush3.bf16.msra.mxu0 %v752_v2  ;;  %714 = vmatprep.subr.bf16.mxu1 %v768_v10  ;;  %s606_s5 = sshll.u32 %s865_s2, 4  ;;  %s607_s5 = int_to_ptr.vmem [resolvable:$true] %s606_s5 }
  0x30   :  { %684 = vmatprep.subr.bf16.mxu0 %v753_v3  ;;  %s834_s6 = scalar_lea.vmem %s607_s5, 2048  ;;  %p839_p2 = scmp.lt.s32.totalorder %s607_s5, %s607_s5 }
  0x31   :  { %p835_p1 = scmp.ne.s32.totalorder %s607_s5, %s834_s6  ;;  %p840_p3 = scmp.lt.s32.totalorder %s834_s6, %s834_s6 }
  0x32   :  { %715 = vmatpush3.bf16.msra.mxu1 %v768_v10 }
  0x33   :  { %685 = vmatpush3.bf16.msra.mxu0 %v753_v3  ;;  %716 = vmatprep.subr.bf16.mxu1 %v769_v12  ;;  %p841_p4 = por %p840_p3, %p839_p2 }
  0x34   :  { %686 = vmatprep.subr.bf16.mxu0 %v754_v5 }
  0x35   :  { %p842_p5 = pnand %p841_p4, %p835_p1 }
  0x36   :  { %717 = vmatpush3.bf16.msra.mxu1 %v769_v12 }
  0x37   :  { %687 = vmatpush3.bf16.msra.mxu0 %v754_v5  ;;  %718 = vmatprep.subr.bf16.mxu1 %v770_v13 }
  0x38   :  { %688 = vmatprep.subr.bf16.mxu0 %v755_v6 }
  0x3a   :  { %719 = vmatpush3.bf16.msra.mxu1 %v770_v13 }
  0x3b   :  { %689 = vmatpush3.bf16.msra.mxu0 %v755_v6  ;;  %720 = vmatprep.subr.bf16.mxu1 %v771_v21 }
  0x3c   :  { %690 = vmatprep.subr.bf16.mxu0 %v756_v9 }
  0x3e   :  { %721 = vmatpush3.bf16.msra.mxu1 %v771_v21 }
  0x3f   :  { %691 = vmatpush3.bf16.msra.mxu0 %v756_v9  ;;  %722 = vmatprep.subr.bf16.mxu1 %v772_v22 }
  0x40   :  { %692 = vmatprep.subr.bf16.mxu0 %v757_v11 }
  0x42   :  { %723 = vmatpush3.bf16.msra.mxu1 %v772_v22 }
  0x43   :  { %693 = vmatpush3.bf16.msra.mxu0 %v757_v11  ;;  %724 = vmatprep.subr.bf16.mxu1 %v773_v23 }
  0x46   :  { %695 = vmatmul.mubr.bf16.vlgmr.msra.gmra.mxu0 %v759_v14  ;;  %725 = vmatpush3.bf16.msra.mxu1 %v773_v23 }
  0x47   :  { %698 = vmatprep.mubr.bf16.mxu0 %v760_v15 }
  0x4e   :  { %699 = vmatmul.mubr.bf16.gmra.mxu0 %v761_v16 }
  0x4f   :  { %702 = vmatprep.mubr.bf16.mxu0 %v762_v17 }
  0x56   :  { %703 = vmatmul.mubr.bf16.gmra.mxu0 %v763_v18 }
  0x57   :  { %706 = vmatprep.mubr.bf16.mxu0 %v764_v19 }
  0x5e   :  { %707 = vmatmul.mubr.bf16.gmra.mxu0 %v765_v20 }
 0x106   :  { %v696_v24 = vpop.f32.mrf.mxu0 }
 0x107   :  { %v386_v30 = vadd.f32 %v696_v24, %v637_v26 }
 0x108   :  { %v263_v25 = vpop.f32.mrf.mxu0 }
 0x109   :  { %v384_v28 = vadd.f32 %v637_v26, %v263_v25  ;;  %v402_v37 = vmax.f32 %v386_v30, 0.0 }
 0x10a   :  { %v697_v27 = vpop.f32.mrf.mxu0 }
 0x10b   :  { %v387_v29 = vadd.f32 %v697_v27, %v637_v26  ;;  %v400_v35 = vmax.f32 %v384_v28, 0.0 }
 0x10c   :  { %v266_v31 = vpop.f32.mrf.mxu0 }
 0x10d   :  { %v385_v32 = vadd.f32 %v637_v26, %v266_v31  ;;  %v403_v33 = vmax.f32 %v387_v29, 0.0 }
 0x10e   :  { %v700_v34 = vpop.f32.mrf.mxu0 }
 0x10f   :  { %v401_v36 = vmax.f32 %v385_v32, 0.0  ;;  %v417_v40 = vpack.c.bf16 %v403_v33, %v402_v37  ;;  %v390_v44 = vadd.f32 %v700_v34, %v637_v26 }
 0x110   :  { %v279_v38 = vpop.f32.mrf.mxu0 }
 0x111   :  { %v416_v39 = vpack.c.bf16 %v401_v36, %v400_v35  ;;  %v388_v42 = vadd.f32 %v637_v26, %v279_v38  ;;  %v406_v51 = vmax.f32 %v390_v44, 0.0 }
 0x112   :  { %v701_v41 = vpop.f32.mrf.mxu0 }
 0x113   :  { %v391_v43 = vadd.f32 %v701_v41, %v637_v26  ;;  %726 = vmatprep.mubr.bf16.mxu1 %v416_v39  ;;  %v404_v49 = vmax.f32 %v388_v42, 0.0 }
 0x114   :  { %v282_v45 = vpop.f32.mrf.mxu0  ;;  %727 = vmatmul.mubr.bf16.vlgmr.msra.gmra.mxu1 %v417_v40 }
 0x115   :  { %v389_v46 = vadd.f32 %v637_v26, %v282_v45  ;;  %v407_v47 = vmax.f32 %v391_v43, 0.0 }
 0x116   :  { %v704_v48 = vpop.f32.mrf.mxu0 }
 0x117   :  { %v405_v50 = vmax.f32 %v389_v46, 0.0  ;;  %v419_v54 = vpack.c.bf16 %v407_v47, %v406_v51  ;;  %v394_v58 = vadd.f32 %v704_v48, %v637_v26 }
 0x118   :  { %v295_v52 = vpop.f32.mrf.mxu0 }
 0x119   :  { %v418_v53 = vpack.c.bf16 %v405_v50, %v404_v49  ;;  %v392_v56 = vadd.f32 %v637_v26, %v295_v52  ;;  %v410_v1 = vmax.f32 %v394_v58, 0.0 }
 0x11a   :  { %v705_v55 = vpop.f32.mrf.mxu0 }
 0x11b   :  { %v395_v57 = vadd.f32 %v705_v55, %v637_v26  ;;  %730 = vmatprep.mubr.bf16.mxu1 %v418_v53  ;;  %v408_v63 = vmax.f32 %v392_v56, 0.0 }
 0x11c   :  { %v298_v59 = vpop.f32.mrf.mxu0  ;;  %731 = vmatmul.mubr.bf16.gmra.mxu1 %v419_v54 }
 0x11d   :  { %v393_v60 = vadd.f32 %v637_v26, %v298_v59  ;;  %v411_v61 = vmax.f32 %v395_v57, 0.0 }
 0x11e   :  { %v708_v62 = vpop.f32.mrf.mxu0 }
 0x11f   :  { %v409_v0 = vmax.f32 %v393_v60, 0.0  ;;  %v421_v4 = vpack.c.bf16 %v411_v61, %v410_v1  ;;  %v398_v8 = vadd.f32 %v708_v62, %v637_v26 }
 0x120   :  { %v311_v2 = vpop.f32.mrf.mxu0 }
 0x121   :  { %v420_v3 = vpack.c.bf16 %v409_v0, %v408_v63  ;;  %v396_v6 = vadd.f32 %v637_v26, %v311_v2  ;;  %v414_v14 = vmax.f32 %v398_v8, 0.0 }
 0x122   :  { %v709_v5 = vpop.f32.mrf.mxu0 }
 0x123   :  { %v399_v7 = vadd.f32 %v709_v5, %v637_v26  ;;  %734 = vmatprep.mubr.bf16.mxu1 %v420_v3  ;;  %v412_v12 = vmax.f32 %v396_v6, 0.0 }
 0x124   :  { %v314_v9 = vpop.f32.mrf.mxu0  ;;  %735 = vmatmul.mubr.bf16.gmra.mxu1 %v421_v4 }
 0x125   :  { %v397_v10 = vadd.f32 %v637_v26, %v314_v9  ;;  %v415_v11 = vmax.f32 %v399_v7, 0.0 }
 0x127   :  { %v413_v13 = vmax.f32 %v397_v10, 0.0  ;;  %v423_v16 = vpack.c.bf16 %v415_v11, %v414_v14 }
 0x129   :  { %v422_v15 = vpack.c.bf16 %v413_v13, %v412_v12 }
 0x12b   :  { %738 = vmatprep.mubr.bf16.mxu1 %v422_v15 }
 0x12c   :  { %739 = vmatmul.mubr.bf16.gmra.mxu1 %v423_v16 }
 0x1d4   :  { %v728_v17 = vpop.f32.mrf.mxu1 }
 0x1d5   :  { %587 = vst [vmem:[#allocation9 + $0x10] sm:$0xff] %v728_v17 }
 0x1d6   :  { %v522_v18 = vpop.f32.mrf.mxu1 }
 0x1d7   :  { %585 = vst [vmem:[#allocation9] sm:$0xff] %v522_v18 }
 0x1d8   :  { %v729_v19 = vpop.f32.mrf.mxu1 }
 0x1d9   :  { %588 = vst [vmem:[#allocation9 + $0x18] sm:$0xff] %v729_v19 }
 0x1da   :  { %v525_v20 = vpop.f32.mrf.mxu1 }
 0x1db   :  { %586 = vst [vmem:[#allocation9 + $0x8] sm:$0xff] %v525_v20 }
 0x1dc   :  { %v732_v21 = vpop.f32.mrf.mxu1 }
 0x1dd   :  { %591 = vst [vmem:[#allocation9 + $0x30] sm:$0xff] %v732_v21 }
 0x1de   :  { %v538_v22 = vpop.f32.mrf.mxu1 }
 0x1df   :  { %589 = vst [vmem:[#allocation9 + $0x20] sm:$0xff] %v538_v22 }
 0x1e0   :  { %v733_v23 = vpop.f32.mrf.mxu1 }
 0x1e1   :  { %592 = vst [vmem:[#allocation9 + $0x38] sm:$0xff] %v733_v23 }
 0x1e2   :  { %v541_v24 = vpop.f32.mrf.mxu1 }
 0x1e3   :  { %590 = vst [vmem:[#allocation9 + $0x28] sm:$0xff] %v541_v24 }
 0x1e4   :  { %v736_v25 = vpop.f32.mrf.mxu1 }
 0x1e5   :  { %595 = vst [vmem:[#allocation9 + $0x50] sm:$0xff] %v736_v25 }
 0x1e6   :  { %v554_v26 = vpop.f32.mrf.mxu1 }
 0x1e7   :  { %593 = vst [vmem:[#allocation9 + $0x40] sm:$0xff] %v554_v26 }
 0x1e8   :  { %v737_v27 = vpop.f32.mrf.mxu1 }
 0x1e9   :  { %596 = vst [vmem:[#allocation9 + $0x58] sm:$0xff] %v737_v27 }
 0x1ea   :  { %v557_v28 = vpop.f32.mrf.mxu1 }
 0x1eb   :  { %594 = vst [vmem:[#allocation9 + $0x48] sm:$0xff] %v557_v28 }
 0x1ec   :  { %v740_v29 = vpop.f32.mrf.mxu1 }
 0x1ed   :  { %599 = vst [vmem:[#allocation9 + $0x70] sm:$0xff] %v740_v29 }
 0x1ee   :  { %v570_v30 = vpop.f32.mrf.mxu1 }
 0x1ef   :  { %597 = vst [vmem:[#allocation9 + $0x60] sm:$0xff] %v570_v30 }
 0x1f0   :  { %v741_v31 = vpop.f32.mrf.mxu1 }
 0x1f1   :  { %600 = vst [vmem:[#allocation9 + $0x78] sm:$0xff] %v741_v31 }
 0x1f2   :  { %v573_v32 = vpop.f32.mrf.mxu1 }
 0x1f3   :  { %598 = vst [vmem:[#allocation9 + $0x68] sm:$0xff] %v573_v32 }
 0x1f4   :  { %845 = shalt.err (!%p842_p5)
}
 0x1f5   :  { %s866_s7 = smov 128   ;;  %s867_s8 = smov 8  }
 0x1f6   :  { %612 = dma.vmem_to_hbm [thread:$0]  %s607_s5, 2048, %s912_s4, [#allocation5], %s866_s7, %s866_s7, %s867_s8  }
 0x1f7   :  { %858 = dma.done.wait [#allocation5], 2048  }
 0x1f8   :  { %859 = vsyncadd [#allocation5], 4294965248 }
 0x1f9   :  { %616 = vsyncpa [#allocation4], 1 }
 0x1fa   :  { %617 = vsyncpa [#allocation7], 1 }
 0x1fb   :  { %618 = vsyncpa [#allocation5], 1 }

</bundles_post_ra>
